<compile_context>
chip_gen: v5e
topology: v5e:2x2
jax: 0.10.0
libtpu: 0.0.40
codegen_flags: <defaults>
</compile_context>

<pallas_src>
import jax
import jax.numpy as jnp
from jax.experimental import pallas as pl
from jax.experimental.pallas import tpu as pltpu


LANE = 128   # lane (last-dim) alignment
SUB = 16     # sublane alignment safe for bf16 packed operands (f32 needs 8)


def _round_up(x: int, m: int) -> int:
    return ((x + m - 1) // m) * m


def _cdiv(a: int, b: int) -> int:
    return -(-a // b)


def _single_k_kernel(x_ref, w_ref, b_ref, o_ref):
    # x: [tm, Kp] bf16, w: [Kp, tn] bf16 (resident across the M grid when
    # grid_n == 1), b: [1, tn] f32, o: [tm, tn] out dtype.
    acc = jnp.dot(x_ref[...], w_ref[...], preferred_element_type=jnp.float32)
    o_ref[...] = (acc + b_ref[...]).astype(o_ref.dtype)
    # TODO(synk): Dropout(0.3) is identity in eval mode; training parity would
    # need pltpu.prng_seed + stateful_bernoulli mask + 1/(1-p) scaling here.


def _multi_k_kernel(x_ref, w_ref, b_ref, o_ref, acc_ref):
    # Fallback for very large K that does not fit a single VMEM step.
    k = pl.program_id(2)

    @pl.when(k == 0)
    def _init():
        # Bias folded into the accumulator init: one broadcast per output tile.
        acc_ref[...] = jnp.broadcast_to(b_ref[...], acc_ref.shape)

    acc_ref[...] += jnp.dot(x_ref[...], w_ref[...],
                            preferred_element_type=jnp.float32)

    @pl.when(k == pl.num_programs(2) - 1)
    def _writeback():
        o_ref[...] = acc_ref[...].astype(o_ref.dtype)


def prepare_text_adapter_params(w_t, b):
    """Cast/pad Linear params once, at parameter-init time.

    w_t: [K, N] (PyTorch weight [N, K] transposed), b: [N].
    Returns (wp [Kp, Np] bf16, bp [1, Np] f32, n_out=N).
    """
    K, N = w_t.shape
    assert b.shape == (N,)
    Kp, Np = _round_up(K, LANE), _round_up(N, LANE)
    wp = jnp.pad(w_t.astype(jnp.bfloat16), ((0, Kp - K), (0, Np - N)))
    bp = jnp.pad(b.astype(jnp.float32), (0, Np - N)).reshape(1, Np)
    return wp, bp, N


def text_adapter_forward(x, wp, bp, n_out, *, tm_max=512, tn_max=512,
                         tk_max=2048, out_dtype=None,
                         vmem_budget=40 * 1024 * 1024):
    """y = x @ W^T + b  (Dropout(0.3) == identity in eval mode).

    x:  [M, K]   activations (streamed as bf16, f32 accumulation).
    wp: [Kp, Np] pre-padded bf16 weight from prepare_text_adapter_params.
    bp: [1, Np]  pre-padded f32 bias.
    Returns [M, n_out] in out_dtype (default: x.dtype).
    """
    M, K = x.shape
    Kp, Np = wp.shape
    assert K <= Kp and bp.shape == (1, Np)
    out_dtype = out_dtype if out_dtype is not None else x.dtype
    out_bytes = jnp.dtype(out_dtype).itemsize

    # ---- N tiling (lane dim). n_embed is small, so normally one lane-dense
    # block -> the weight's block index is grid-invariant and stays resident.
    if Np <= tn_max:
        tn = Np
    else:
        tn = tn_max
        if Np % tn:
            pad = _round_up(Np, tn) - Np
            wp = jnp.pad(wp, ((0, 0), (0, pad)))
            bp = jnp.pad(bp, ((0, 0), (0, pad)))
            Np += pad
    grid_n = Np // tn

    # ---- M tiling (sublane dim): pad only to 16; split into >=2 blocks when
    # M is big enough so v7x's two TensorCores both get work.
    Mp_min = _round_up(max(M, SUB), SUB)
    if Mp_min >= 64:
        tm = min(tm_max, _round_up(_cdiv(Mp_min, 2), SUB))
    else:
        tm = Mp_min
    grid_m = _cdiv(Mp_min, tm)
    Mp = grid_m * tm

    # ---- K tiling: collapse the reduction to one step whenever it fits VMEM.
    def vmem_need(tk):
        return (2 * tm * tk * 2            # x tile, bf16, double-buffered
                + 2 * tk * tn * 2          # w tile, bf16
                + 2 * tn * 4               # bias
                + 2 * tm * tn * out_bytes  # out tile
                + tm * tn * 4)             # acc scratch (multi-K worst case)

    single_k = vmem_need(Kp) <= vmem_budget
    if single_k:
        tk, grid_k, Kp_used = Kp, 1, Kp
    else:
        grid_k = _cdiv(Kp, tk_max)
        tk = _round_up(_cdiv(Kp, grid_k), LANE)
        Kp_used = grid_k * tk
        if Kp_used > Kp:
            wp = jnp.pad(wp, ((0, Kp_used - Kp), (0, 0)))

    # ---- Activation cast/pad (zero padding is exact for matmul); skipped
    # entirely when the caller already hands us aligned bf16 activations.
    xp = x if x.dtype == jnp.bfloat16 else x.astype(jnp.bfloat16)
    if Mp > M or Kp_used > K:
        xp = jnp.pad(xp, ((0, Mp - M), (0, Kp_used - K)))

    cost = pl.CostEstimate(
        flops=2 * Mp * Np * Kp_used,
        transcendentals=0,
        bytes_accessed=(Mp * Kp_used * 2 + Kp_used * Np * 2
                        + Mp * Np * out_bytes + Np * 4),
    )
    vmem_limit = int(min(48 * 1024 * 1024,
                         max(32 * 1024 * 1024, vmem_need(tk) + (8 << 20))))

    if single_k:
        out = pl.pallas_call(
            _single_k_kernel,
            out_shape=jax.ShapeDtypeStruct((Mp, Np), out_dtype),
            grid=(grid_m, grid_n),
            in_specs=[
                pl.BlockSpec((tm, tk), lambda i, j: (i, 0)),
                pl.BlockSpec((tk, tn), lambda i, j: (0, j)),  # resident weight
                pl.BlockSpec((1, tn), lambda i, j: (0, j)),
            ],
            out_specs=pl.BlockSpec((tm, tn), lambda i, j: (i, j)),
            compiler_params=pltpu.CompilerParams(
                dimension_semantics=("parallel", "parallel"),
                vmem_limit_bytes=vmem_limit,
            ),
            cost_estimate=cost,
        )(xp, wp, bp)
    else:
        out = pl.pallas_call(
            _multi_k_kernel,
            out_shape=jax.ShapeDtypeStruct((Mp, Np), out_dtype),
            grid=(grid_m, grid_n, grid_k),
            in_specs=[
                pl.BlockSpec((tm, tk), lambda i, j, k: (i, k)),
                pl.BlockSpec((tk, tn), lambda i, j, k: (k, j)),
                pl.BlockSpec((1, tn), lambda i, j, k: (0, j)),
            ],
            out_specs=pl.BlockSpec((tm, tn), lambda i, j, k: (i, j)),
            scratch_shapes=[pltpu.VMEM((tm, tn), jnp.float32)],
            compiler_params=pltpu.CompilerParams(
                dimension_semantics=("parallel", "parallel", "arbitrary"),
                vmem_limit_bytes=vmem_limit,
            ),
            cost_estimate=cost,
        )(xp, wp, bp)

    if Mp > M or Np > n_out:
        out = out[:M, :n_out]
    return out


def _check(key, batch, n_embed, atol=2e-2, rtol=2e-2, **fwd_kwargs):
    in_features = 4 * n_embed
    k_x, k_w, k_b = jax.random.split(key, 3)

    # PyTorch Linear stores W as [out, in]; kernel uses the transposed layout.
    bound = 1.0 / (in_features ** 0.5)
    w = jax.random.uniform(k_w, (n_embed, in_features),
                           minval=-bound, maxval=bound, dtype=jnp.float32)
    b = jax.random.uniform(k_b, (n_embed,),
                           minval=-bound, maxval=bound, dtype=jnp.float32)
    x = jax.random.normal(k_x, (batch, in_features), dtype=jnp.float32)

    # Weight/bias cast+pad happens ONCE here (parameter-init time), not per call.
    wp, bp, n_out = prepare_text_adapter_params(w.T, b)

    out = jax.block_until_ready(
        text_adapter_forward(x, wp, bp, n_out, **fwd_kwargs))
    ref = x @ w.T + b  # dropout == identity in eval mode
    assert out.shape == (batch, n_embed)
    # bf16 operands -> loosened tolerance (f32 accumulation keeps it tight).
    assert jnp.allclose(out, ref, atol=atol, rtol=rtol), \
        float(jnp.max(jnp.abs(out - ref)))


if __name__ == "__main__":
    key = jax.random.PRNGKey(0)
    k0, k1, k2 = jax.random.split(key, 3)

    # Small shape implied by the module: n_embed=32 -> in_features=128, batch=8.
    _check(k0, batch=8, n_embed=32)

    # Larger shape: exercises the >=2-block parallel M axis, minimal (16-row)
    # M padding, resident weight with K collapsed to a single step.
    _check(k1, batch=300, n_embed=160)

    # Force the multi-K fallback path (tiny VMEM budget) to cover the
    # accumulator-scratch kernel as well.
    _check(k2, batch=64, n_embed=160, vmem_budget=1 << 16, tk_max=256)

    print("KERNEL_OK")
</pallas_src>

<mosaic_0001>
module attributes {stable_mosaic.version = 11 : i64} {
  func.func @_single_k_kernel(%arg0: i32, %arg1: i32, %arg2: memref<16x128xbf16, #tpu.memory_space<vmem>>, %arg3: memref<128x128xbf16, #tpu.memory_space<vmem>>, %arg4: memref<1x128xf32, #tpu.memory_space<vmem>>, %arg5: memref<16x128xf32, #tpu.memory_space<vmem>>) attributes {dimension_semantics = [#tpu.dimension_semantics<parallel>, #tpu.dimension_semantics<parallel>], iteration_bounds = array<i64: 1, 1>, scalar_prefetch = 0 : i64, scratch_operands = 0 : i64, tpu.core_type = #tpu.core_type<tc>, window_params = [{transform_indices = @transform_0, window_bounds = array<i64: 16, 128>}, {transform_indices = @transform_1, window_bounds = array<i64: 128, 128>}, {transform_indices = @transform_2, window_bounds = array<i64: 1, 128>}, {transform_indices = @transform_3, window_bounds = array<i64: 16, 128>}]} {
    %c0 = arith.constant 0 : index
    %c0_0 = arith.constant 0 : index
    %0 = vector.load %arg2[%c0, %c0_0] : memref<16x128xbf16, #tpu.memory_space<vmem>>, vector<16x128xbf16>
    %c0_1 = arith.constant 0 : index
    %c0_2 = arith.constant 0 : index
    %1 = vector.load %arg3[%c0_1, %c0_2] : memref<128x128xbf16, #tpu.memory_space<vmem>>, vector<128x128xbf16>
    %cst = arith.constant dense<0.000000e+00> : vector<16x128xf32>
    %2 = tpu.matmul %0, %1, %cst {dimension_numbers = #tpu.dot_dimension_numbers<[1], [0], [0], [1], [0, 0, 1, 1], [], []>} : vector<16x128xbf16>, vector<128x128xbf16>, vector<16x128xf32> -> vector<16x128xf32>
    %c0_3 = arith.constant 0 : index
    %c0_4 = arith.constant 0 : index
    %3 = vector.load %arg4[%c0_3, %c0_4] : memref<1x128xf32, #tpu.memory_space<vmem>>, vector<1x128xf32>
    %4 = vector.broadcast %3 : vector<1x128xf32> to vector<16x128xf32>
    %5 = arith.addf %2, %4 : vector<16x128xf32>
    %c0_5 = arith.constant 0 : index
    %c0_6 = arith.constant 0 : index
    %6 = vector.load %arg5[%c0_5, %c0_6] : memref<16x128xf32, #tpu.memory_space<vmem>>, vector<16x128xf32>
    tpu.vector_store %arg5[%c0_5, %c0_6], %5 {strides = array<i32>} : memref<16x128xf32, #tpu.memory_space<vmem>>, vector<16x128xf32>,
    return
  }
  func.func @transform_0(%arg0: i32, %arg1: i32) -> (i32, i32) {
    %c0_i32 = arith.constant 0 : i32
    %c0_i32_0 = arith.constant 0 : i32
    return %arg0, %c0_i32 : i32, i32
  }
  func.func @transform_1(%arg0: i32, %arg1: i32) -> (i32, i32) {
    %c0_i32 = arith.constant 0 : i32
    %c0_i32_0 = arith.constant 0 : i32
    return %c0_i32, %arg1 : i32, i32
  }
  func.func @transform_2(%arg0: i32, %arg1: i32) -> (i32, i32) {
    %c0_i32 = arith.constant 0 : i32
    %c0_i32_0 = arith.constant 0 : i32
    return %c0_i32, %arg1 : i32, i32
  }
  func.func @transform_3(%arg0: i32, %arg1: i32) -> (i32, i32) {
    %c0_i32 = arith.constant 0 : i32
    return %arg0, %arg1 : i32, i32
  }
}

</mosaic_0001>

<bundles_post_ra>
// kernel: tpu_custom_call.1
= control target key start
LH: loop header
LB: loop body
LE: loop exit
PB: predicated region body
PF: predicated region fallthrough
CT: control target
= control target key end

     0   :  { %8 = vsyncpa [#allocation3], 0  ;;  %s329_s0 = inlined_call_operand.hbm [shape: bf16[16,128], index: 0, kind: input, shape index: {}]   ;;  %s330_s1 = inlined_call_operand.hbm [shape: bf16[128,128], index: 1, kind: input, shape index: {}]   ;;  %s331_s2 = inlined_call_operand.vmem [shape: f32[1,128], index: 2, kind: input, shape index: {}]   ;;  %s332_s3 = inlined_call_operand.hbm [shape: f32[16,128], index: 3, kind: output, shape index: {}]  }
   0x1   :  { %9 = vsyncpa [#allocation6], 0 }
   0x2   :  { %10 = vsyncpa [#allocation4], 0  ;;  %s15_s14 = sshll.u32 %s329_s0, 4  ;;  %s290_s15 = smov [#allocation2]   ;;  %s16_s14 = int_to_ptr.hbm [resolvable:$true] %s15_s14 }
   0x3   :  { %s17_s16 = sshll.u32 %s290_s15, 4  ;;  %s28_s19 = sshll.u32 %s330_s1, 4  ;;  %s18_s16 = int_to_ptr.vmem [resolvable:$true] %s17_s16  ;;  %s29_s19 = int_to_ptr.hbm [resolvable:$true] %s28_s19 }
   0x4   :  { %s291_s20 = smov 64   ;;  %s292_s21 = smov 4  }
   0x5   :  { %23 = dma.hbm_to_vmem [thread:$0]  %s16_s14, 128, %s18_s16, [#allocation3], %s291_s20, %s291_s20, %s292_s21  }
   0x6   :  { %s293_s22 = smov [#allocation5]  }
   0x7   :  { %s30_s23 = sshll.u32 %s293_s22, 4  ;;  %s31_s23 = int_to_ptr.vmem [resolvable:$true] %s30_s23 }
   0x8   :  { %36 = dma.hbm_to_vmem [thread:$0]  %s29_s19, 1024, %s31_s23, [#allocation6], %s291_s20, %s291_s20, %s292_s21  }
   0x9   :  { %284 = dma.done.wait [#allocation3], 128  }
   0xa   :  { %285 = vsyncadd [#allocation3], 4294967168 }
   0xb   :  { %286 = dma.done.wait [#allocation6], 1024  }
   0xc   :  { %287 = vsyncadd [#allocation6], 4294966272  ;;  %v203_v0 = vld [vmem:[#allocation5 + $0x38] sm:$0xff]  ;;  %v202_v1 = vld [vmem:[#allocation5 + $0x30] sm:$0xff]  ;;  %s294_s24 = smov [#allocation7]   ;;  %s145_s28 = sshll.u32 %s332_s3, 4  ;;  %s146_s28 = int_to_ptr.hbm [resolvable:$true] %s145_s28 }
   0xd   :  { %123 = vmatpush.bf16.msra.mxu0 %v203_v0  ;;  %v201_v2 = vld [vmem:[#allocation5 + $0x28] sm:$0xff]  ;;  %v200_v3 = vld [vmem:[#allocation5 + $0x20] sm:$0xff]  ;;  %v199_v4 = vld [vmem:[#allocation5 + $0x18] sm:$0xff]  ;;  %s143_s25 = sshll.u32 %s294_s24, 4  ;;  %s295_s29 = smov 128   ;;  %s144_s25 = int_to_ptr.vmem [resolvable:$true] %s143_s25 }
   0xe   :  { %v198_v5 = vld [vmem:[#allocation5 + $0x10] sm:$0xff]  ;;  %v197_v6 = vld [vmem:[#allocation5 + $0x8] sm:$0xff]  ;;  %v196_v7 = vld [vmem:[#allocation5] sm:$0xff]  ;;  %s296_s30 = smov 8  }
   0xf   :  { %v195_v8 = vld [vmem:[#allocation2] sm:$0xff] }
  0x10   :  { %v211_v9 = vld [vmem:[%s331_s2] ss:$0 sm:$0xff] }
  0x11   :  { %124 = vmatpush.bf16.msra.mxu0 %v202_v1 }
  0x15   :  { %125 = vmatpush.bf16.msra.mxu0 %v201_v2 }
  0x19   :  { %126 = vmatpush.bf16.msra.mxu0 %v200_v3 }
  0x1d   :  { %127 = vmatpush.bf16.msra.mxu0 %v199_v4 }
  0x21   :  { %128 = vmatpush.bf16.msra.mxu0 %v198_v5 }
  0x25   :  { %129 = vmatpush.bf16.msra.mxu0 %v197_v6 }
  0x29   :  { %130 = vmatpush.bf16.msra.mxu0 %v196_v7 }
  0x2c   :  { %131 = vmatmul.bf16.vlgmr.msra.gmra.mxu0 %v195_v8 }
  0xa9   :  { %v132_v10 = vpop.f32.mrf.mxu0 }
  0xaa   :  { %v133_v11 = vadd.f32 %v211_v9, %v132_v10 }
  0xac   :  { %137 = vst [vmem:[#allocation7] sm:$0xff] %v133_v11 }
  0xb1   :  { %v134_v12 = vpop.f32.mrf.mxu0 }
  0xb2   :  { %v135_v13 = vadd.f32 %v211_v9, %v134_v12 }
  0xb4   :  { %138 = vst [vmem:[#allocation7 + $0x8] sm:$0xff] %v135_v13 }
  0xb5   :  { %151 = dma.vmem_to_hbm [thread:$0]  %s144_s25, 256, %s146_s28, [#allocation4], %s295_s29, %s295_s29, %s296_s30  }
  0xb6   :  { %288 = dma.done.wait [#allocation4], 256  }
  0xb7   :  { %289 = vsyncadd [#allocation4], 4294967040 }
  0xb8   :  { %156 = vsyncpa [#allocation3], 1 }
  0xb9   :  { %157 = vsyncpa [#allocation6], 1 }
  0xba   :  { %158 = vsyncpa [#allocation4], 1 }

</bundles_post_ra>
